<compile_context>
chip_gen: v6e
topology: v6e:2x2x1
jax: 0.10.0
libtpu: 0.0.40
codegen_flags: <defaults>
</compile_context>

<pallas_src>
import jax
import jax.numpy as jnp
from jax.experimental import pallas as pl
from jax.experimental.pallas import tpu as pltpu  # noqa: F401  (TPU backend)


def _add_kernel(a_ref, b_ref, o_ref):
    # Full tiles resident in VMEM; pure VPU elementwise add.
    # a_ref is read into vregs before the (HBM-aliased) output is written, so
    # the in-place alias cannot corrupt the result.
    o_ref[...] = a_ref[...] + b_ref[...]


def _sublane_rows(n: int, dtype) -> int:
    """Row count that fills the packed sublane dimension of a vreg.

    A vreg is (8 sublanes x 128 lanes) of 32-bit words; sub-32-bit dtypes pack
    along sublanes, so the "full" sublane count is 8 * (4 / itemsize):
      f32 -> 8, bf16/f16 -> 16, int8/fp8 -> 32.
    Falls back to the largest power-of-two divisor of n if it doesn't divide.
    """
    itemsize = jnp.dtype(dtype).itemsize
    rows = 8 * max(1, 4 // itemsize)
    while rows > 1 and n % rows != 0:
        rows //= 2
    return rows


def _residual_add_impl(a: jax.Array, b: jax.Array) -> jax.Array:
    assert a.shape == b.shape and a.dtype == b.dtype
    orig_shape = a.shape
    n = a.size
    itemsize = jnp.dtype(a.dtype).itemsize

    # Lane-dense 2D slab: e.g. (1, 176, 14, 14) f32 -> (8, 4312).
    rows = _sublane_rows(n, a.dtype)
    cols = n // rows
    a2 = a.reshape(rows, cols)  # metadata-only under jit
    b2 = b.reshape(rows, cols)

    out2 = pl.pallas_call(
        _add_kernel,
        out_shape=jax.ShapeDtypeStruct((rows, cols), a.dtype),
        # Full-array blocks on the flattened 2D shape; no grid at this size.
        in_specs=[
            pl.BlockSpec((rows, cols), lambda: (0, 0)),
            pl.BlockSpec((rows, cols), lambda: (0, 0)),
        ],
        out_specs=pl.BlockSpec((rows, cols), lambda: (0, 0)),
        # Residual add is destructive on the first operand's buffer (safe for
        # inference where x287 is not consumed afterwards).
        input_output_aliases={0: 0},
        # Advisory: this custom call is tiny (n adds, 3*n*itemsize bytes).
        cost_estimate=pl.CostEstimate(
            flops=n, transcendentals=0, bytes_accessed=3 * n * itemsize
        ),
    )(a2, b2)

    return out2.reshape(orig_shape)


# jit so the reshapes are zero-copy bitcasts; donate the first argument so the
# in-kernel alias actually elides the output HBM allocation.
residual_add = jax.jit(_residual_add_impl, donate_argnums=0)


if __name__ == "__main__":
    key = jax.random.PRNGKey(0)
    k1, k2 = jax.random.split(key)
    # Shapes from the module: [1, 176, 14, 14] (NCHW), f32.
    x287 = jax.random.normal(k1, (1, 176, 14, 14), dtype=jnp.float32)
    x272 = jax.random.normal(k2, (1, 176, 14, 14), dtype=jnp.float32)

    # Compute the reference BEFORE calling the kernel: x287 is donated (its
    # buffer is consumed in place by the kernel).
    ref = x287 + x272

    out = residual_add(x287, x272)
    jax.block_until_ready(out)

    assert out.shape == (1, 176, 14, 14)
    assert out.dtype == jnp.float32
    assert jnp.allclose(out, ref), "mismatch vs reference add"
    print("KERNEL_OK")
</pallas_src>

<mosaic_0001>
module attributes {stable_mosaic.version = 11 : i64} {
  func.func @_add_kernel(%arg0: memref<8x4312xf32, #tpu.memory_space<vmem>>, %arg1: memref<8x4312xf32, #tpu.memory_space<vmem>>, %arg2: memref<8x4312xf32, #tpu.memory_space<vmem>>) attributes {dimension_semantics = [], scalar_prefetch = 0 : i64, scratch_operands = 0 : i64, tpu.core_type = #tpu.core_type<tc>} {
    %c0 = arith.constant 0 : index
    %c0_0 = arith.constant 0 : index
    %0 = vector.load %arg0[%c0, %c0_0] : memref<8x4312xf32, #tpu.memory_space<vmem>>, vector<8x4312xf32>
    %c0_1 = arith.constant 0 : index
    %c0_2 = arith.constant 0 : index
    %1 = vector.load %arg1[%c0_1, %c0_2] : memref<8x4312xf32, #tpu.memory_space<vmem>>, vector<8x4312xf32>
    %2 = arith.addf %0, %1 : vector<8x4312xf32>
    %c0_3 = arith.constant 0 : index
    %c0_4 = arith.constant 0 : index
    %3 = vector.load %arg2[%c0_3, %c0_4] : memref<8x4312xf32, #tpu.memory_space<vmem>>, vector<8x4312xf32>
    tpu.vector_store %arg2[%c0_3, %c0_4], %2 {strides = array<i32>} : memref<8x4312xf32, #tpu.memory_space<vmem>>, vector<8x4312xf32>,
    return
  }
}

</mosaic_0001>

<bundles_post_ra>
// kernel: _residual_add_impl.1
= control target key start
LH: loop header
LB: loop body
LE: loop exit
PB: predicated region body
PF: predicated region fallthrough
CT: control target
= control target key end

     0   :  { %vm146_vm0 = vcmask 719872   ;;  %s473_s0 = inlined_call_operand.vmem [shape: f32[8,4312], index: 0, kind: input, shape index: {}, may-alias: {0,2}]   ;;  %s474_s1 = inlined_call_operand.vmem [shape: f32[8,4312], index: 1, kind: input, shape index: {}]   ;;  %s475_s2 = inlined_call_operand.vmem [shape: f32[8,4312], index: 2, kind: output, shape index: {}, may-alias: {0,2}]  }
   0x1   :  { %v11_v0 = vld [vmem:[%s473_s0] sm:$0xff]  ;;  %v12_v2 = vld [vmem:[%s473_s0 + $0x8] sm:$0xff]  ;;  %v13_v5 = vld [vmem:[%s473_s0 + $0x10] sm:$0xff] }
   0x2   :  { %v45_v1 = vld [vmem:[%s474_s1] sm:$0xff]  ;;  %v46_v4 = vld [vmem:[%s474_s1 + $0x8] sm:$0xff]  ;;  %v47_v6 = vld [vmem:[%s474_s1 + $0x10] sm:$0xff] }
   0x3   :  { %v79_v3 = vadd.f32 %v45_v1, %v11_v0  ;;  %v80_v7 = vadd.f32 %v46_v4, %v12_v2  ;;  %v81_v8 = vadd.f32 %v47_v6, %v13_v5  ;;  %v14_v9 = vld [vmem:[%s473_s0 + $0x18] sm:$0xff]  ;;  %v15_v11 = vld [vmem:[%s473_s0 + $0x20] sm:$0xff]  ;;  %v50_v15 = vld [vmem:[%s474_s1 + $0x28] sm:$0xff] }
   0x4   :  { %v48_v10 = vld [vmem:[%s474_s1 + $0x18] sm:$0xff]  ;;  %v49_v13 = vld [vmem:[%s474_s1 + $0x20] sm:$0xff]  ;;  %v51_v19 = vld [vmem:[%s474_s1 + $0x30] sm:$0xff] }
   0x5   :  { %113 = vst [vmem:[%s475_s2] sm:$0xff] %v79_v3  ;;  %v82_v12 = vadd.f32 %v48_v10, %v14_v9  ;;  %v83_v16 = vadd.f32 %v49_v13, %v15_v11  ;;  %v52_v22 = vld [vmem:[%s474_s1 + $0x38] sm:$0xff]  ;;  %v53_v24 = vld [vmem:[%s474_s1 + $0x40] sm:$0xff]  ;;  %v54_v28 = vld [vmem:[%s474_s1 + $0x48] sm:$0xff] }
   0x6   :  { %v55_v31 = vld [vmem:[%s474_s1 + $0x50] sm:$0xff]  ;;  %v56_v33 = vld [vmem:[%s474_s1 + $0x58] sm:$0xff]  ;;  %v57_v37 = vld [vmem:[%s474_s1 + $0x60] sm:$0xff] }
   0x7   :  { %v58_v40 = vld [vmem:[%s474_s1 + $0x68] sm:$0xff]  ;;  %v59_v42 = vld [vmem:[%s474_s1 + $0x70] sm:$0xff]  ;;  %v60_v46 = vld [vmem:[%s474_s1 + $0x78] sm:$0xff] }
   0x8   :  { %v61_v49 = vld [vmem:[%s474_s1 + $0x80] sm:$0xff]  ;;  %v62_v51 = vld [vmem:[%s474_s1 + $0x88] sm:$0xff]  ;;  %v63_v55 = vld [vmem:[%s474_s1 + $0x90] sm:$0xff] }
   0x9   :  { %v64_v58 = vld [vmem:[%s474_s1 + $0x98] sm:$0xff]  ;;  %v65_v60 = vld [vmem:[%s474_s1 + $0xa0] sm:$0xff]  ;;  %v66_v0 = vld [vmem:[%s474_s1 + $0xa8] sm:$0xff] }
   0xa   :  { %v67_v3 = vld [vmem:[%s474_s1 + $0xb0] sm:$0xff]  ;;  %v68_v5 = vld [vmem:[%s474_s1 + $0xb8] sm:$0xff]  ;;  %v69_v9 = vld [vmem:[%s474_s1 + $0xc0] sm:$0xff] }
   0xc   :  { %v16_v14 = vld [vmem:[%s473_s0 + $0x28] sm:$0xff] }
   0xd   :  { %114 = vst [vmem:[%s475_s2 + $0x8] sm:$0xff] %v80_v7  ;;  %115 = vst [vmem:[%s475_s2 + $0x10] sm:$0xff] %v81_v8  ;;  %v84_v17 = vadd.f32 %v50_v15, %v16_v14  ;;  %v71_v14 = vld [vmem:[%s474_s1 + $0xd0] sm:$0xff] }
  0x14   :  { %v17_v18 = vld [vmem:[%s473_s0 + $0x30] sm:$0xff]  ;;  %v18_v20 = vld [vmem:[%s473_s0 + $0x38] sm:$0xff] }
  0x15   :  { %116 = vst [vmem:[%s475_s2 + $0x18] sm:$0xff] %v82_v12  ;;  %v85_v21 = vadd.f32 %v51_v19, %v17_v18  ;;  %v86_v25 = vadd.f32 %v52_v22, %v18_v20  ;;  %v70_v12 = vld [vmem:[%s474_s1 + $0xc8] sm:$0xff]  ;;  %v72_v18 = vld [vmem:[%s474_s1 + $0xd8] sm:$0xff] }
  0x1c   :  { %v19_v23 = vld [vmem:[%s473_s0 + $0x40] sm:$0xff] }
  0x1d   :  { %117 = vst [vmem:[%s475_s2 + $0x20] sm:$0xff] %v83_v16  ;;  %118 = vst [vmem:[%s475_s2 + $0x28] sm:$0xff] %v84_v17  ;;  %v87_v26 = vadd.f32 %v53_v24, %v19_v23  ;;  %v74_v23 = vld [vmem:[%s474_s1 + $0xe8] sm:$0xff] }
  0x24   :  { %v20_v27 = vld [vmem:[%s473_s0 + $0x48] sm:$0xff]  ;;  %v21_v29 = vld [vmem:[%s473_s0 + $0x50] sm:$0xff] }
  0x25   :  { %119 = vst [vmem:[%s475_s2 + $0x30] sm:$0xff] %v85_v21  ;;  %v88_v30 = vadd.f32 %v54_v28, %v20_v27  ;;  %v89_v34 = vadd.f32 %v55_v31, %v21_v29  ;;  %v73_v21 = vld [vmem:[%s474_s1 + $0xe0] sm:$0xff]  ;;  %v75_v27 = vld [vmem:[%s474_s1 + $0xf0] sm:$0xff] }
  0x2c   :  { %v22_v32 = vld [vmem:[%s473_s0 + $0x58] sm:$0xff] }
  0x2d   :  { %120 = vst [vmem:[%s475_s2 + $0x38] sm:$0xff] %v86_v25  ;;  %121 = vst [vmem:[%s475_s2 + $0x40] sm:$0xff] %v87_v26  ;;  %v90_v35 = vadd.f32 %v56_v33, %v22_v32  ;;  %v77_v32 = vld [vmem:[%s474_s1 + $0x100] sm:$0xff] }
  0x34   :  { %v23_v36 = vld [vmem:[%s473_s0 + $0x60] sm:$0xff]  ;;  %v24_v38 = vld [vmem:[%s473_s0 + $0x68] sm:$0xff] }
  0x35   :  { %122 = vst [vmem:[%s475_s2 + $0x48] sm:$0xff] %v88_v30  ;;  %v91_v39 = vadd.f32 %v57_v37, %v23_v36  ;;  %v92_v43 = vadd.f32 %v58_v40, %v24_v38  ;;  %v76_v30 = vld [vmem:[%s474_s1 + $0xf8] sm:$0xff]  ;;  %v78_v36 = vld [vmem:[%s474_s1 + $0x108] sm:$0xff] }
  0x3c   :  { %v25_v41 = vld [vmem:[%s473_s0 + $0x70] sm:$0xff] }
  0x3d   :  { %123 = vst [vmem:[%s475_s2 + $0x50] sm:$0xff] %v89_v34  ;;  %124 = vst [vmem:[%s475_s2 + $0x58] sm:$0xff] %v90_v35  ;;  %v93_v44 = vadd.f32 %v59_v42, %v25_v41 }
  0x44   :  { %v26_v45 = vld [vmem:[%s473_s0 + $0x78] sm:$0xff]  ;;  %v27_v47 = vld [vmem:[%s473_s0 + $0x80] sm:$0xff] }
  0x45   :  { %125 = vst [vmem:[%s475_s2 + $0x60] sm:$0xff] %v91_v39  ;;  %v94_v48 = vadd.f32 %v60_v46, %v26_v45  ;;  %v95_v52 = vadd.f32 %v61_v49, %v27_v47 }
  0x4c   :  { %v28_v50 = vld [vmem:[%s473_s0 + $0x88] sm:$0xff] }
  0x4d   :  { %126 = vst [vmem:[%s475_s2 + $0x68] sm:$0xff] %v92_v43  ;;  %127 = vst [vmem:[%s475_s2 + $0x70] sm:$0xff] %v93_v44  ;;  %v96_v53 = vadd.f32 %v62_v51, %v28_v50 }
  0x54   :  { %v29_v54 = vld [vmem:[%s473_s0 + $0x90] sm:$0xff]  ;;  %v30_v56 = vld [vmem:[%s473_s0 + $0x98] sm:$0xff] }
  0x55   :  { %128 = vst [vmem:[%s475_s2 + $0x78] sm:$0xff] %v94_v48  ;;  %v97_v57 = vadd.f32 %v63_v55, %v29_v54  ;;  %v98_v61 = vadd.f32 %v64_v58, %v30_v56 }
  0x5c   :  { %v31_v59 = vld [vmem:[%s473_s0 + $0xa0] sm:$0xff] }
  0x5d   :  { %129 = vst [vmem:[%s475_s2 + $0x80] sm:$0xff] %v95_v52  ;;  %130 = vst [vmem:[%s475_s2 + $0x88] sm:$0xff] %v96_v53  ;;  %v99_v62 = vadd.f32 %v65_v60, %v31_v59 }
  0x64   :  { %v32_v63 = vld [vmem:[%s473_s0 + $0xa8] sm:$0xff]  ;;  %v33_v1 = vld [vmem:[%s473_s0 + $0xb0] sm:$0xff] }
  0x65   :  { %131 = vst [vmem:[%s475_s2 + $0x90] sm:$0xff] %v97_v57  ;;  %v100_v2 = vadd.f32 %v66_v0, %v32_v63  ;;  %v101_v6 = vadd.f32 %v67_v3, %v33_v1 }
  0x6c   :  { %v34_v4 = vld [vmem:[%s473_s0 + $0xb8] sm:$0xff] }
  0x6d   :  { %132 = vst [vmem:[%s475_s2 + $0x98] sm:$0xff] %v98_v61  ;;  %133 = vst [vmem:[%s475_s2 + $0xa0] sm:$0xff] %v99_v62  ;;  %v102_v7 = vadd.f32 %v68_v5, %v34_v4 }
  0x74   :  { %v35_v8 = vld [vmem:[%s473_s0 + $0xc0] sm:$0xff]  ;;  %v36_v10 = vld [vmem:[%s473_s0 + $0xc8] sm:$0xff] }
  0x75   :  { %134 = vst [vmem:[%s475_s2 + $0xa8] sm:$0xff] %v100_v2  ;;  %v103_v11 = vadd.f32 %v69_v9, %v35_v8  ;;  %v104_v15 = vadd.f32 %v70_v12, %v36_v10 }
  0x7c   :  { %v37_v13 = vld [vmem:[%s473_s0 + $0xd0] sm:$0xff] }
  0x7d   :  { %135 = vst [vmem:[%s475_s2 + $0xb0] sm:$0xff] %v101_v6  ;;  %136 = vst [vmem:[%s475_s2 + $0xb8] sm:$0xff] %v102_v7  ;;  %v105_v16 = vadd.f32 %v71_v14, %v37_v13 }
  0x84   :  { %v38_v17 = vld [vmem:[%s473_s0 + $0xd8] sm:$0xff]  ;;  %v39_v19 = vld [vmem:[%s473_s0 + $0xe0] sm:$0xff] }
  0x85   :  { %137 = vst [vmem:[%s475_s2 + $0xc0] sm:$0xff] %v103_v11  ;;  %v106_v20 = vadd.f32 %v72_v18, %v38_v17  ;;  %v107_v24 = vadd.f32 %v73_v21, %v39_v19 }
  0x8c   :  { %v40_v22 = vld [vmem:[%s473_s0 + $0xe8] sm:$0xff] }
  0x8d   :  { %138 = vst [vmem:[%s475_s2 + $0xc8] sm:$0xff] %v104_v15  ;;  %139 = vst [vmem:[%s475_s2 + $0xd0] sm:$0xff] %v105_v16  ;;  %v108_v25 = vadd.f32 %v74_v23, %v40_v22 }
  0x94   :  { %v41_v26 = vld [vmem:[%s473_s0 + $0xf0] sm:$0xff]  ;;  %v42_v28 = vld [vmem:[%s473_s0 + $0xf8] sm:$0xff] }
  0x95   :  { %140 = vst [vmem:[%s475_s2 + $0xd8] sm:$0xff] %v106_v20  ;;  %v109_v29 = vadd.f32 %v75_v27, %v41_v26  ;;  %v110_v33 = vadd.f32 %v76_v30, %v42_v28 }
  0x9c   :  { %v43_v31 = vld [vmem:[%s473_s0 + $0x100] sm:$0xff] }
  0x9d   :  { %141 = vst [vmem:[%s475_s2 + $0xe0] sm:$0xff] %v107_v24  ;;  %142 = vst [vmem:[%s475_s2 + $0xe8] sm:$0xff] %v108_v25  ;;  %v111_v34 = vadd.f32 %v77_v32, %v43_v31 }
  0xa4   :  { %v44_v35 = vld [vmem:[%s473_s0 + $0x108] sm:$0xff] }
  0xa5   :  { %143 = vst [vmem:[%s475_s2 + $0xf0] sm:$0xff] %v109_v29  ;;  %v112_v37 = vadd.f32 %v78_v36, %v44_v35  ;;  %144 = vst [vmem:[%s475_s2 + $0xf8] sm:$0xff] %v110_v33 }
  0xa6   :  { %145 = vst [vmem:[%s475_s2 + $0x100] sm:$0xff] %v111_v34 }
  0xa7   :  { %147 = vst.msk [vmem:[%s475_s2 + $0x108] sm:$0xff] %vm146_vm0, %v112_v37 }

</bundles_post_ra>
